<compile_context>
chip_gen: v7x
topology: tpu7x:2x2x1
jax: 0.10.0
libtpu: 0.0.40
codegen_flags: <defaults>
</compile_context>

<pallas_src>
import jax
import jax.numpy as jnp
from jax.experimental import pallas as pl
from jax.experimental.pallas import tpu as pltpu

HIDDEN = 32          # hidden_channels
IN_FEATS = 5         # linear1 input dim (fixed by the module)
OUT_FEATS = 30 * 2   # linear3 output dim (fixed by the module)
N_NODES = 16         # small synthetic graph
N_EDGES = 40

FEAT_PAD = 128       # lane-dense padded feature width for all layers
N_LAYERS = 7
LAYER_ORDER = ("lin1", "lin2", "lin4", "lin5", "conv2", "conv3", "lin3")


def gnn_mtl_kernel(x_ref, adj_ref, w_ref, b_ref, out_ref):
    """Whole forward pass in one VMEM-resident block.

    x_ref  : (N, 128)        zero-padded node features
    adj_ref: (N, N)          normalized adjacency (with self loops)
    w_ref  : (7, 128, 128)   pre-transposed, zero-padded weights (in, out)
    b_ref  : (8, 128)        zero-padded biases (rows 0..6 valid)
    out_ref: (N, 128)        padded output (first 60 lanes valid)
    """
    f32 = jnp.float32
    x = x_ref[...]
    adj = adj_ref[...]
    b = b_ref[...]                      # one vreg-sized load for all biases

    def lin(i, h):
        # w_ref[i] is already (in_pad, out_pad): no transpose needed.
        return jnp.dot(h, w_ref[i], preferred_element_type=f32) + b[i:i + 1, :]

    # x = relu(linear1(x)); x = relu(linear2(x))
    h = jnp.maximum(lin(0, x), 0.0)
    h = jnp.maximum(lin(1, h), 0.0)

    # x = relu(linear4(x)) + x ; x = relu(linear5(x)) + x
    h = jnp.maximum(lin(2, h), 0.0) + h
    h = jnp.maximum(lin(3, h), 0.0) + h

    # x = relu(conv2(x, edge_index))  ->  relu(Â (H Wc2) + bc2)
    m = jnp.dot(h, w_ref[4], preferred_element_type=f32)
    h = jnp.maximum(
        jnp.dot(adj, m, preferred_element_type=f32) + b[4:5, :], 0.0)

    # x = relu(conv3(x, edge_index))
    m = jnp.dot(h, w_ref[5], preferred_element_type=f32)
    h = jnp.maximum(
        jnp.dot(adj, m, preferred_element_type=f32) + b[5:6, :], 0.0)

    # x = linear3(x)    (valid lanes 0..59; padded lanes are exactly 0)
    out_ref[...] = jnp.dot(h, w_ref[6], preferred_element_type=f32) + b[6:7, :]


def _linear_params(key, in_dim, out_dim):
    """Deterministic init mimicking torch.nn.Linear (uniform +-1/sqrt(fan_in))."""
    kw, kb = jax.random.split(key)
    bound = 1.0 / jnp.sqrt(jnp.float32(in_dim))
    w = jax.random.uniform(kw, (out_dim, in_dim), jnp.float32, -bound, bound)
    b = jax.random.uniform(kb, (1, out_dim), jnp.float32, -bound, bound)
    return w, b


def init_params(seed=21):
    key = jax.random.PRNGKey(seed)
    keys = jax.random.split(key, 7)
    p = {}
    p["lin1"] = _linear_params(keys[0], IN_FEATS, 64)
    p["lin2"] = _linear_params(keys[1], 64, HIDDEN)
    p["lin4"] = _linear_params(keys[2], HIDDEN, HIDDEN)
    p["lin5"] = _linear_params(keys[3], HIDDEN, HIDDEN)
    p["conv2"] = _linear_params(keys[4], HIDDEN, HIDDEN)
    p["conv3"] = _linear_params(keys[5], HIDDEN, HIDDEN)
    p["lin3"] = _linear_params(keys[6], HIDDEN, OUT_FEATS)
    return p


def pack_params(params):
    """Pre-transpose, zero-pad to 128x128, and pack into two contiguous slabs."""
    w_slab = jnp.zeros((N_LAYERS, FEAT_PAD, FEAT_PAD), jnp.float32)
    b_slab = jnp.zeros((8, FEAT_PAD), jnp.float32)   # 8 sublane rows (7 used)
    for i, name in enumerate(LAYER_ORDER):
        w, bias = params[name]            # w: (out, in), bias: (1, out)
        wt = w.T                          # (in, out) -- done once, host-side
        w_slab = w_slab.at[i, :wt.shape[0], :wt.shape[1]].set(wt)
        b_slab = b_slab.at[i, :bias.shape[1]].set(bias[0])
    return w_slab, b_slab


def build_norm_adj(edge_index, num_nodes):
    """Dense D^{-1/2}(A+I)D^{-1/2} from COO edge_index (2, E); plain-JAX glue.

    Duplicate edges accumulate (matches PyG gcn_norm edge-weight summation).
    """
    src, dst = edge_index[0], edge_index[1]
    a = jnp.zeros((num_nodes, num_nodes), jnp.float32)
    a = a.at[dst, src].add(1.0)                    # message flows src -> dst
    a = a + jnp.eye(num_nodes, dtype=jnp.float32)  # self loops
    deg = a.sum(axis=1)
    dinv = jax.lax.rsqrt(jnp.maximum(deg, 1e-12))
    return dinv[:, None] * a * dinv[None, :]


@jax.jit
def gnn_mtl_forward(x, edge_index, w_slab, b_slab):
    n = x.shape[0]
    adj = build_norm_adj(edge_index, n)

    # Zero-pad input features to the lane-dense width.
    x_pad = jnp.zeros((n, FEAT_PAD), jnp.float32).at[:, :x.shape[1]].set(x)

    vmem = pl.BlockSpec(memory_space=pltpu.MemorySpace.VMEM)
    out_pad = pl.pallas_call(
        gnn_mtl_kernel,
        out_shape=jax.ShapeDtypeStruct((n, FEAT_PAD), jnp.float32),
        in_specs=[vmem, vmem, vmem, vmem],
        out_specs=vmem,
        cost_estimate=pl.CostEstimate(
            flops=2 * (N_LAYERS * n * FEAT_PAD * FEAT_PAD
                       + 2 * n * n * FEAT_PAD),
            transcendentals=0,
            bytes_accessed=4 * (N_LAYERS * FEAT_PAD * FEAT_PAD
                                + 8 * FEAT_PAD
                                + 2 * n * FEAT_PAD
                                + n * n),
        ),
    )(x_pad, adj, w_slab, b_slab)

    # Slice back to the module's true output width.
    return out_pad[:, :OUT_FEATS]


if __name__ == "__main__":
    key = jax.random.PRNGKey(0)
    kx, ke = jax.random.split(key)
    x = jax.random.normal(kx, (N_NODES, IN_FEATS), jnp.float32)
    edge_index = jax.random.randint(ke, (2, N_EDGES), 0, N_NODES, jnp.int32)

    params = init_params(seed=21)
    w_slab, b_slab = pack_params(params)   # packed once, reused every call

    out = gnn_mtl_forward(x, edge_index, w_slab, b_slab)
    jax.block_until_ready(out)
    assert out.shape == (N_NODES, OUT_FEATS) and out.dtype == jnp.float32
    print("KERNEL_OK")
</pallas_src>

<mosaic_0001>
module attributes {stable_mosaic.version = 11 : i64} {
  func.func @gnn_mtl_kernel(%arg0: memref<16x128xf32, #tpu.memory_space<vmem>>, %arg1: memref<16x16xf32, #tpu.memory_space<vmem>>, %arg2: memref<7x128x128xf32, #tpu.memory_space<vmem>>, %arg3: memref<8x128xf32, #tpu.memory_space<vmem>>, %arg4: memref<16x128xf32, #tpu.memory_space<vmem>>) attributes {dimension_semantics = [], scalar_prefetch = 0 : i64, scratch_operands = 0 : i64, tpu.core_type = #tpu.core_type<tc>} {
    %c0 = arith.constant 0 : index
    %c0_0 = arith.constant 0 : index
    %0 = vector.load %arg0[%c0, %c0_0] : memref<16x128xf32, #tpu.memory_space<vmem>>, vector<16x128xf32>
    %c0_1 = arith.constant 0 : index
    %c0_2 = arith.constant 0 : index
    %1 = vector.load %arg1[%c0_1, %c0_2] : memref<16x16xf32, #tpu.memory_space<vmem>>, vector<16x16xf32>
    %c0_3 = arith.constant 0 : index
    %c0_4 = arith.constant 0 : index
    %2 = vector.load %arg3[%c0_3, %c0_4] : memref<8x128xf32, #tpu.memory_space<vmem>>, vector<8x128xf32>
    %c0_5 = arith.constant 0 : index
    %c0_6 = arith.constant 0 : index
    %c0_7 = arith.constant 0 : index
    %3 = vector.load %arg2[%c0_5, %c0_6, %c0_7] : memref<7x128x128xf32, #tpu.memory_space<vmem>>, vector<1x128x128xf32>
    %4 = vector.shape_cast %3 : vector<1x128x128xf32> to vector<128x128xf32>
    %cst = arith.constant dense<0.000000e+00> : vector<16x128xf32>
    %5 = tpu.matmul %0, %4, %cst {dimension_numbers = #tpu.dot_dimension_numbers<[1], [0], [0], [1], [0, 0, 1, 1], [], []>} : vector<16x128xf32>, vector<128x128xf32>, vector<16x128xf32> -> vector<16x128xf32>
    %6 = vector.extract_strided_slice %2 {offsets = [0, 0], sizes = [1, 128], strides = [1, 1]} : vector<8x128xf32> to vector<1x128xf32>
    %7 = vector.broadcast %6 : vector<1x128xf32> to vector<16x128xf32>
    %8 = arith.addf %5, %7 : vector<16x128xf32>
    %cst_8 = arith.constant 0.000000e+00 : f32
    %9 = vector.broadcast %cst_8 : f32 to vector<16x128xf32>
    %10 = arith.maximumf %8, %9 : vector<16x128xf32>
    %c1 = arith.constant 1 : index
    %c0_9 = arith.constant 0 : index
    %c0_10 = arith.constant 0 : index
    %11 = vector.load %arg2[%c1, %c0_9, %c0_10] : memref<7x128x128xf32, #tpu.memory_space<vmem>>, vector<1x128x128xf32>
    %12 = vector.shape_cast %11 : vector<1x128x128xf32> to vector<128x128xf32>
    %cst_11 = arith.constant dense<0.000000e+00> : vector<16x128xf32>
    %13 = tpu.matmul %10, %12, %cst_11 {dimension_numbers = #tpu.dot_dimension_numbers<[1], [0], [0], [1], [0, 0, 1, 1], [], []>} : vector<16x128xf32>, vector<128x128xf32>, vector<16x128xf32> -> vector<16x128xf32>
    %14 = vector.extract_strided_slice %2 {offsets = [1, 0], sizes = [1, 128], strides = [1, 1]} : vector<8x128xf32> to vector<1x128xf32>
    %15 = vector.broadcast %14 : vector<1x128xf32> to vector<16x128xf32>
    %16 = arith.addf %13, %15 : vector<16x128xf32>
    %cst_12 = arith.constant 0.000000e+00 : f32
    %17 = vector.broadcast %cst_12 : f32 to vector<16x128xf32>
    %18 = arith.maximumf %16, %17 : vector<16x128xf32>
    %c2 = arith.constant 2 : index
    %c0_13 = arith.constant 0 : index
    %c0_14 = arith.constant 0 : index
    %19 = vector.load %arg2[%c2, %c0_13, %c0_14] : memref<7x128x128xf32, #tpu.memory_space<vmem>>, vector<1x128x128xf32>
    %20 = vector.shape_cast %19 : vector<1x128x128xf32> to vector<128x128xf32>
    %cst_15 = arith.constant dense<0.000000e+00> : vector<16x128xf32>
    %21 = tpu.matmul %18, %20, %cst_15 {dimension_numbers = #tpu.dot_dimension_numbers<[1], [0], [0], [1], [0, 0, 1, 1], [], []>} : vector<16x128xf32>, vector<128x128xf32>, vector<16x128xf32> -> vector<16x128xf32>
    %22 = vector.extract_strided_slice %2 {offsets = [2, 0], sizes = [1, 128], strides = [1, 1]} : vector<8x128xf32> to vector<1x128xf32>
    %23 = vector.broadcast %22 : vector<1x128xf32> to vector<16x128xf32>
    %24 = arith.addf %21, %23 : vector<16x128xf32>
    %cst_16 = arith.constant 0.000000e+00 : f32
    %25 = vector.broadcast %cst_16 : f32 to vector<16x128xf32>
    %26 = arith.maximumf %24, %25 : vector<16x128xf32>
    %27 = arith.addf %26, %18 : vector<16x128xf32>
    %c3 = arith.constant 3 : index
    %c0_17 = arith.constant 0 : index
    %c0_18 = arith.constant 0 : index
    %28 = vector.load %arg2[%c3, %c0_17, %c0_18] : memref<7x128x128xf32, #tpu.memory_space<vmem>>, vector<1x128x128xf32>
    %29 = vector.shape_cast %28 : vector<1x128x128xf32> to vector<128x128xf32>
    %cst_19 = arith.constant dense<0.000000e+00> : vector<16x128xf32>
    %30 = tpu.matmul %27, %29, %cst_19 {dimension_numbers = #tpu.dot_dimension_numbers<[1], [0], [0], [1], [0, 0, 1, 1], [], []>} : vector<16x128xf32>, vector<128x128xf32>, vector<16x128xf32> -> vector<16x128xf32>
    %31 = vector.extract_strided_slice %2 {offsets = [3, 0], sizes = [1, 128], strides = [1, 1]} : vector<8x128xf32> to vector<1x128xf32>
    %32 = vector.broadcast %31 : vector<1x128xf32> to vector<16x128xf32>
    %33 = arith.addf %30, %32 : vector<16x128xf32>
    %cst_20 = arith.constant 0.000000e+00 : f32
    %34 = vector.broadcast %cst_20 : f32 to vector<16x128xf32>
    %35 = arith.maximumf %33, %34 : vector<16x128xf32>
    %36 = arith.addf %35, %27 : vector<16x128xf32>
    %c4 = arith.constant 4 : index
    %c0_21 = arith.constant 0 : index
    %c0_22 = arith.constant 0 : index
    %37 = vector.load %arg2[%c4, %c0_21, %c0_22] : memref<7x128x128xf32, #tpu.memory_space<vmem>>, vector<1x128x128xf32>
    %38 = vector.shape_cast %37 : vector<1x128x128xf32> to vector<128x128xf32>
    %cst_23 = arith.constant dense<0.000000e+00> : vector<16x128xf32>
    %39 = tpu.matmul %36, %38, %cst_23 {dimension_numbers = #tpu.dot_dimension_numbers<[1], [0], [0], [1], [0, 0, 1, 1], [], []>} : vector<16x128xf32>, vector<128x128xf32>, vector<16x128xf32> -> vector<16x128xf32>
    %cst_24 = arith.constant dense<0.000000e+00> : vector<16x128xf32>
    %40 = tpu.matmul %1, %39, %cst_24 {dimension_numbers = #tpu.dot_dimension_numbers<[1], [0], [0], [1], [0, 0, 1, 1], [], []>} : vector<16x16xf32>, vector<16x128xf32>, vector<16x128xf32> -> vector<16x128xf32>
    %41 = vector.extract_strided_slice %2 {offsets = [4, 0], sizes = [1, 128], strides = [1, 1]} : vector<8x128xf32> to vector<1x128xf32>
    %42 = vector.broadcast %41 : vector<1x128xf32> to vector<16x128xf32>
    %43 = arith.addf %40, %42 : vector<16x128xf32>
    %cst_25 = arith.constant 0.000000e+00 : f32
    %44 = vector.broadcast %cst_25 : f32 to vector<16x128xf32>
    %45 = arith.maximumf %43, %44 : vector<16x128xf32>
    %c5 = arith.constant 5 : index
    %c0_26 = arith.constant 0 : index
    %c0_27 = arith.constant 0 : index
    %46 = vector.load %arg2[%c5, %c0_26, %c0_27] : memref<7x128x128xf32, #tpu.memory_space<vmem>>, vector<1x128x128xf32>
    %47 = vector.shape_cast %46 : vector<1x128x128xf32> to vector<128x128xf32>
    %cst_28 = arith.constant dense<0.000000e+00> : vector<16x128xf32>
    %48 = tpu.matmul %45, %47, %cst_28 {dimension_numbers = #tpu.dot_dimension_numbers<[1], [0], [0], [1], [0, 0, 1, 1], [], []>} : vector<16x128xf32>, vector<128x128xf32>, vector<16x128xf32> -> vector<16x128xf32>
    %cst_29 = arith.constant dense<0.000000e+00> : vector<16x128xf32>
    %49 = tpu.matmul %1, %48, %cst_29 {dimension_numbers = #tpu.dot_dimension_numbers<[1], [0], [0], [1], [0, 0, 1, 1], [], []>} : vector<16x16xf32>, vector<16x128xf32>, vector<16x128xf32> -> vector<16x128xf32>
    %50 = vector.extract_strided_slice %2 {offsets = [5, 0], sizes = [1, 128], strides = [1, 1]} : vector<8x128xf32> to vector<1x128xf32>
    %51 = vector.broadcast %50 : vector<1x128xf32> to vector<16x128xf32>
    %52 = arith.addf %49, %51 : vector<16x128xf32>
    %cst_30 = arith.constant 0.000000e+00 : f32
    %53 = vector.broadcast %cst_30 : f32 to vector<16x128xf32>
    %54 = arith.maximumf %52, %53 : vector<16x128xf32>
    %c6 = arith.constant 6 : index
    %c0_31 = arith.constant 0 : index
    %c0_32 = arith.constant 0 : index
    %55 = vector.load %arg2[%c6, %c0_31, %c0_32] : memref<7x128x128xf32, #tpu.memory_space<vmem>>, vector<1x128x128xf32>
    %56 = vector.shape_cast %55 : vector<1x128x128xf32> to vector<128x128xf32>
    %cst_33 = arith.constant dense<0.000000e+00> : vector<16x128xf32>
    %57 = tpu.matmul %54, %56, %cst_33 {dimension_numbers = #tpu.dot_dimension_numbers<[1], [0], [0], [1], [0, 0, 1, 1], [], []>} : vector<16x128xf32>, vector<128x128xf32>, vector<16x128xf32> -> vector<16x128xf32>
    %58 = vector.extract_strided_slice %2 {offsets = [6, 0], sizes = [1, 128], strides = [1, 1]} : vector<8x128xf32> to vector<1x128xf32>
    %59 = vector.broadcast %58 : vector<1x128xf32> to vector<16x128xf32>
    %60 = arith.addf %57, %59 : vector<16x128xf32>
    %c0_34 = arith.constant 0 : index
    %c0_35 = arith.constant 0 : index
    %61 = vector.load %arg4[%c0_34, %c0_35] : memref<16x128xf32, #tpu.memory_space<vmem>>, vector<16x128xf32>
    tpu.vector_store %arg4[%c0_34, %c0_35], %60 {strides = array<i32>} : memref<16x128xf32, #tpu.memory_space<vmem>>, vector<16x128xf32>,
    return
  }
}

</mosaic_0001>

<bundles_post_ra>
// kernel: gnn_mtl_forward.1
= control target key start
LH: loop header
LB: loop body
LE: loop exit
PB: predicated region body
PF: predicated region fallthrough
CT: control target
= control target key end

     0   :  { %s2054_s0 = inlined_call_operand.vmem [shape: f32[16,128], index: 0, kind: input, shape index: {}]   ;;  %s2055_s1 = inlined_call_operand.vmem [shape: f32[16,16], index: 1, kind: input, shape index: {}]   ;;  %s2056_s2 = inlined_call_operand.vmem [shape: f32[7,128,128], index: 2, kind: input, shape index: {}]   ;;  %s2057_s3 = inlined_call_operand.vmem [shape: f32[8,128], index: 3, kind: input, shape index: {}]   ;;  %s2058_s4 = inlined_call_operand.hbm [shape: f32[16,128], index: 4, kind: output, shape index: {}]  }
   0x1   :  { %v23_v0 = vld [vmem:[%s2056_s2] sm:$0xff]  ;;  %v24_v1 = vld [vmem:[%s2056_s2 + $0x8] sm:$0xff]  ;;  %v25_v2 = vld [vmem:[%s2056_s2 + $0x10] sm:$0xff] }
   0x2   :  { %v1378_v3 = vpack.c.bf16 %v24_v1, %v23_v0  ;;  %v26_v4 = vld [vmem:[%s2056_s2 + $0x18] sm:$0xff]  ;;  %v27_v6 = vld [vmem:[%s2056_s2 + $0x20] sm:$0xff]  ;;  %v28_v7 = vld [vmem:[%s2056_s2 + $0x28] sm:$0xff] }
   0x3   :  { %v1382_v5 = vpack.c.bf16 %v26_v4, %v25_v2  ;;  %v1386_v8 = vpack.c.bf16 %v28_v7, %v27_v6  ;;  %v29_v9 = vld [vmem:[%s2056_s2 + $0x30] sm:$0xff]  ;;  %v30_v10 = vld [vmem:[%s2056_s2 + $0x38] sm:$0xff]  ;;  %v18_v11 = vld [vmem:[%s2054_s0] sm:$0xff] }
   0x4   :  { %1379 = vmatprep.subr.bf16.mxu0 %v1378_v3  ;;  %1151 = vmatprep.mubr.f32.mxu0 %v18_v11  ;;  %v885_v12 = vld [vmem:[%s2056_s2 + $0x80] sm:$0xff]  ;;  %v886_v13 = vld [vmem:[%s2056_s2 + $0x88] sm:$0xff]  ;;  %v887_v14 = vld [vmem:[%s2056_s2 + $0x90] sm:$0xff]  ;;  %v1390_v20 = vpack.c.bf16 %v30_v10, %v29_v9 }
   0x5   :  { %1381 = vmatpush3.bf16.msra.mxu0 %v1378_v3  ;;  %v1410_v15 = vpack.c.bf16 %v886_v13, %v885_v12  ;;  %v888_v16 = vld [vmem:[%s2056_s2 + $0x98] sm:$0xff]  ;;  %v889_v18 = vld [vmem:[%s2056_s2 + $0xa0] sm:$0xff]  ;;  %v890_v19 = vld [vmem:[%s2056_s2 + $0xa8] sm:$0xff] }
   0x6   :  { %1383 = vmatprep.subr.bf16.mxu0 %v1382_v5  ;;  %v1414_v17 = vpack.c.bf16 %v888_v16, %v887_v14  ;;  %v31_v21 = vld [vmem:[%s2056_s2 + $0x40] sm:$0xff]  ;;  %v32_v22 = vld [vmem:[%s2056_s2 + $0x48] sm:$0xff]  ;;  %v1418_v23 = vpack.c.bf16 %v890_v19, %v889_v18 }
   0x7   :  { %1411 = vmatprep.subr.bf16.mxu1 %v1410_v15 }
   0x8   :  { %1413 = vmatpush3.bf16.msra.mxu1 %v1410_v15 }
   0x9   :  { %1385 = vmatpush3.bf16.msra.mxu0 %v1382_v5  ;;  %1415 = vmatprep.subr.bf16.mxu1 %v1414_v17 }
   0xa   :  { %1387 = vmatprep.subr.bf16.mxu0 %v1386_v8 }
   0xb   :  { %9 = vsyncpa [#allocation3], 0  ;;  %v891_v24 = vld [vmem:[%s2056_s2 + $0xb0] sm:$0xff]  ;;  %v892_v25 = vld [vmem:[%s2056_s2 + $0xb8] sm:$0xff]  ;;  %v1394_v26 = vpack.c.bf16 %v32_v22, %v31_v21  ;;  %v39_v7 = vlaneseq  ;;  %vm514_vm0 = vcmask 130048  }
   0xc   :  { %v33_v27 = vld [vmem:[%s2056_s2 + $0x50] sm:$0xff]  ;;  %v34_v28 = vld [vmem:[%s2056_s2 + $0x58] sm:$0xff]  ;;  %1417 = vmatpush3.bf16.msra.mxu1 %v1414_v17  ;;  %v1422_v29 = vpack.c.bf16 %v892_v25, %v891_v24  ;;  %v893_v30 = vld [vmem:[%s2056_s2 + $0xc0] sm:$0xff] }
   0xd   :  { %1389 = vmatpush3.bf16.msra.mxu0 %v1386_v8  ;;  %1419 = vmatprep.subr.bf16.mxu1 %v1418_v23  ;;  %v894_v31 = vld [vmem:[%s2056_s2 + $0xc8] sm:$0xff]  ;;  %v1398_v32 = vpack.c.bf16 %v34_v28, %v33_v27  ;;  %v35_v33 = vld [vmem:[%s2056_s2 + $0x60] sm:$0xff]  ;;  %v895_v36 = vld [vmem:[%s2056_s2 + $0xd0] sm:$0xff]  ;;  %v1809_v8 = vshrl.u32 %v39_v7, 7 }
   0xe   :  { %1391 = vmatprep.subr.bf16.mxu0 %v1390_v20  ;;  %v36_v34 = vld [vmem:[%s2056_s2 + $0x68] sm:$0xff]  ;;  %v1426_v35 = vpack.c.bf16 %v894_v31, %v893_v30  ;;  %v896_v37 = vld [vmem:[%s2056_s2 + $0xd8] sm:$0xff]  ;;  %v37_v39 = vld [vmem:[%s2056_s2 + $0x70] sm:$0xff] }
   0xf   :  { %v1402_v38 = vpack.c.bf16 %v36_v34, %v35_v33  ;;  %v38_v40 = vld [vmem:[%s2056_s2 + $0x78] sm:$0xff]  ;;  %v1430_v41 = vpack.c.bf16 %v896_v37, %v895_v36  ;;  %v897_v42 = vld [vmem:[%s2056_s2 + $0xe0] sm:$0xff]  ;;  %v898_v43 = vld [vmem:[%s2056_s2 + $0xe8] sm:$0xff]  ;;  %v41_v9 = vsub.s32 0, %v1809_v8  ;;  %v237_v7 = vsub.s32 2, %v1809_v8 }
  0x10   :  { %1421 = vmatpush3.bf16.msra.mxu1 %v1418_v23  ;;  %v1406_v44 = vpack.c.bf16 %v38_v40, %v37_v39  ;;  %v1434_v45 = vpack.c.bf16 %v898_v43, %v897_v42  ;;  %v19_v46 = vld [vmem:[%s2054_s0 + $0x8] sm:$0xff]  ;;  %v899_v47 = vld [vmem:[%s2056_s2 + $0xf0] sm:$0xff]  ;;  %v900_v48 = vld [vmem:[%s2056_s2 + $0xf8] sm:$0xff]  ;;  %v139_v39 = vsub.s32 1, %v1809_v8 }
  0x11   :  { %1393 = vmatpush3.bf16.msra.mxu0 %v1390_v20  ;;  %1423 = vmatprep.subr.bf16.mxu1 %v1422_v29  ;;  %v1438_v49 = vpack.c.bf16 %v900_v48, %v899_v47  ;;  %v901_v50 = vld [vmem:[%s2056_s2 + $0x100] sm:$0xff]  ;;  %v902_v51 = vld [vmem:[%s2056_s2 + $0x108] sm:$0xff]  ;;  %v903_v52 = vld [vmem:[%s2056_s2 + $0x110] sm:$0xff] }
  0x12   :  { %1395 = vmatprep.subr.bf16.mxu0 %v1394_v26  ;;  %v1442_v53 = vpack.c.bf16 %v902_v51, %v901_v50  ;;  %v904_v54 = vld [vmem:[%s2056_s2 + $0x118] sm:$0xff]  ;;  %v905_v56 = vld [vmem:[%s2056_s2 + $0x120] sm:$0xff]  ;;  %v906_v57 = vld [vmem:[%s2056_s2 + $0x128] sm:$0xff] }
  0x13   :  { %v1446_v55 = vpack.c.bf16 %v904_v54, %v903_v52  ;;  %v1450_v58 = vpack.c.bf16 %v906_v57, %v905_v56  ;;  %v907_v59 = vld [vmem:[%s2056_s2 + $0x130] sm:$0xff]  ;;  %v908_v60 = vld [vmem:[%s2056_s2 + $0x138] sm:$0xff]  ;;  %v909_v62 = vld [vmem:[%s2056_s2 + $0x140] sm:$0xff] }
  0x14   :  { %1425 = vmatpush3.bf16.msra.mxu1 %v1422_v29  ;;  %v1454_v61 = vpack.c.bf16 %v908_v60, %v907_v59  ;;  %v910_v63 = vld [vmem:[%s2056_s2 + $0x148] sm:$0xff]  ;;  %v911_v1 = vld [vmem:[%s2056_s2 + $0x150] sm:$0xff]  ;;  %v912_v2 = vld [vmem:[%s2056_s2 + $0x158] sm:$0xff] }
  0x15   :  { %1397 = vmatpush3.bf16.msra.mxu0 %v1394_v26  ;;  %1427 = vmatprep.subr.bf16.mxu1 %v1426_v35  ;;  %v1458_v0 = vpack.c.bf16 %v910_v63, %v909_v62  ;;  %v1462_v3 = vpack.c.bf16 %v912_v2, %v911_v1  ;;  %v913_v4 = vld [vmem:[%s2056_s2 + $0x160] sm:$0xff]  ;;  %v914_v5 = vld [vmem:[%s2056_s2 + $0x168] sm:$0xff]  ;;  %v915_v18 = vld [vmem:[%s2056_s2 + $0x170] sm:$0xff] }
  0x16   :  { %1399 = vmatprep.subr.bf16.mxu0 %v1398_v32  ;;  %v1466_v6 = vpack.c.bf16 %v914_v5, %v913_v4  ;;  %v1815_v10 = vld [vmem:[%s2057_s3] sm:$0xff]  ;;  %v916_v19 = vld [vmem:[%s2056_s2 + $0x178] sm:$0xff]  ;;  %v918_v22 = vld [vmem:[%s2056_s2 + $0x188] sm:$0xff] }
  0x17   :  { %v42_v11 = vrot.slane %v1815_v10, %v41_v9  ;;  %v1470_v20 = vpack.c.bf16 %v916_v19, %v915_v18  ;;  %v917_v21 = vld [vmem:[%s2056_s2 + $0x180] sm:$0xff]  ;;  %v919_v23 = vld [vmem:[%s2056_s2 + $0x190] sm:$0xff]  ;;  %v920_v25 = vld [vmem:[%s2056_s2 + $0x198] sm:$0xff]  ;;  %v140_v40 = vrot.slane %v1815_v10, %v139_v39  ;;  %v238_v9 = vrot.slane %v1815_v10, %v237_v7 }
  0x18   :  { %1429 = vmatpush3.bf16.msra.mxu1 %v1426_v35  ;;  %v1474_v24 = vpack.c.bf16 %v918_v22, %v917_v21  ;;  %v1478_v26 = vpack.c.bf16 %v920_v25, %v919_v23  ;;  %v921_v27 = vld [vmem:[%s2056_s2 + $0x1a0] sm:$0xff]  ;;  %v922_v28 = vld [vmem:[%s2056_s2 + $0x1a8] sm:$0xff]  ;;  %v923_v30 = vld [vmem:[%s2056_s2 + $0x1b0] sm:$0xff]  ;;  %v337_v25 = vsub.s32 3, %v1809_v8 }
  0x19   :  { %1401 = vmatpush3.bf16.msra.mxu0 %v1398_v32  ;;  %1431 = vmatprep.subr.bf16.mxu1 %v1430_v41  ;;  %v1482_v29 = vpack.c.bf16 %v922_v28, %v921_v27  ;;  %v924_v31 = vld [vmem:[%s2056_s2 + $0x1b8] sm:$0xff]  ;;  %v925_v33 = vld [vmem:[%s2056_s2 + $0x1c0] sm:$0xff]  ;;  %v926_v34 = vld [vmem:[%s2056_s2 + $0x1c8] sm:$0xff] }
  0x1a   :  { %1403 = vmatprep.subr.bf16.mxu0 %v1402_v38  ;;  %v1486_v32 = vpack.c.bf16 %v924_v31, %v923_v30  ;;  %v1490_v35 = vpack.c.bf16 %v926_v34, %v925_v33  ;;  %v927_v36 = vld [vmem:[%s2056_s2 + $0x1d0] sm:$0xff]  ;;  %v928_v37 = vld [vmem:[%s2056_s2 + $0x1d8] sm:$0xff]  ;;  %v929_v47 = vld [vmem:[%s2056_s2 + $0x1e0] sm:$0xff] }
  0x1b   :  { %v930_v48 = vld [vmem:[%s2056_s2 + $0x1e8] sm:$0xff]  ;;  %v931_v50 = vld [vmem:[%s2056_s2 + $0x1f0] sm:$0xff]  ;;  %v932_v51 = vld [vmem:[%s2056_s2 + $0x1f8] sm:$0xff] }
  0x1c   :  { %1433 = vmatpush3.bf16.msra.mxu1 %v1430_v41  ;;  %v1502_v52 = vpack.c.bf16 %v932_v51, %v931_v50  ;;  %v934_v54 = vld [vmem:[%s2056_s2 + $0x208] sm:$0xff]  ;;  %v936_v57 = vld [vmem:[%s2056_s2 + $0x218] sm:$0xff]  ;;  %v937_v59 = vld [vmem:[%s2056_s2 + $0x220] sm:$0xff] }
  0x1d   :  { %1405 = vmatpush3.bf16.msra.mxu0 %v1402_v38  ;;  %1435 = vmatprep.subr.bf16.mxu1 %v1434_v45  ;;  %v1494_v38 = vpack.c.bf16 %v928_v37, %v927_v36  ;;  %v938_v60 = vld [vmem:[%s2056_s2 + $0x228] sm:$0xff]  ;;  %v939_v62 = vld [vmem:[%s2056_s2 + $0x230] sm:$0xff]  ;;  %v940_v63 = vld [vmem:[%s2056_s2 + $0x238] sm:$0xff] }
  0x1e   :  { %1407 = vmatprep.subr.bf16.mxu0 %v1406_v44  ;;  %v941_v1 = vld [vmem:[%s2056_s2 + $0x240] sm:$0xff]  ;;  %v942_v2 = vld [vmem:[%s2056_s2 + $0x248] sm:$0xff]  ;;  %v943_v4 = vld [vmem:[%s2056_s2 + $0x250] sm:$0xff] }
  0x1f   :  { %v944_v5 = vld [vmem:[%s2056_s2 + $0x258] sm:$0xff]  ;;  %v945_v19 = vld [vmem:[%s2056_s2 + $0x260] sm:$0xff]  ;;  %v947_v22 = vld [vmem:[%s2056_s2 + $0x270] sm:$0xff] }
  0x20   :  { %1437 = vmatpush3.bf16.msra.mxu1 %v1434_v45  ;;  %v948_v23 = vld [vmem:[%s2056_s2 + $0x278] sm:$0xff]  ;;  %v951_v36 = vld [vmem:[%s2056_s2 + $0x280] sm:$0xff]  ;;  %v952_v37 = vld [vmem:[%s2056_s2 + $0x288] sm:$0xff] }
  0x21   :  { %1409 = vmatpush3.bf16.msra.mxu0 %v1406_v44  ;;  %1439 = vmatprep.subr.bf16.mxu1 %v1438_v49  ;;  %v958_v50 = vld [vmem:[%s2056_s2 + $0x2b8] sm:$0xff] }
  0x22   :  { %1443 = vmatprep.subr.bf16.mxu0 %v1442_v53 }
  0x24   :  { %1152 = vmatmul.mubr.f32.vlgmr.msra.gmra.mrb[0].mxu0 %v19_v46  ;;  %1441 = vmatpush3.bf16.msra.mxu1 %v1438_v49  ;;  %v1498_v49 = vpack.c.bf16 %v930_v48, %v929_v47  ;;  %v956_v47 = vld [vmem:[%s2056_s2 + $0x2a8] sm:$0xff] }
  0x25   :  { %1445 = vmatpush3.bf16.msra.mxu0 %v1442_v53  ;;  %1475 = vmatprep.subr.bf16.mxu1 %v1474_v24  ;;  %v933_v53 = vld [vmem:[%s2056_s2 + $0x200] sm:$0xff] }
  0x26   :  { %1447 = vmatprep.subr.bf16.mxu0 %v1446_v55  ;;  %v1506_v56 = vpack.c.bf16 %v934_v54, %v933_v53  ;;  %v960_v53 = vld [vmem:[%s2056_s2 + $0x2c8] sm:$0xff] }
  0x29   :  { %1449 = vmatpush3.bf16.msra.mxu0 %v1446_v55  ;;  %v935_v55 = vld [vmem:[%s2056_s2 + $0x210] sm:$0xff] }
  0x2a   :  { %1451 = vmatprep.subr.bf16.mxu0 %v1450_v58 }
  0x2d   :  { %1453 = vmatpush3.bf16.msra.mxu0 %v1450_v58  ;;  %v1510_v58 = vpack.c.bf16 %v936_v57, %v935_v55  ;;  %v961_v55 = vld [vmem:[%s2056_s2 + $0x2d0] sm:$0xff] }
  0x2e   :  { %1455 = vmatprep.subr.bf16.mxu0 %v1454_v61 }
  0x31   :  { %1457 = vmatpush3.bf16.msra.mxu0 %v1454_v61  ;;  %v1514_v61 = vpack.c.bf16 %v938_v60, %v937_v59  ;;  %v964_v59 = vld [vmem:[%s2056_s2 + $0x2e8] sm:$0xff] }
  0x32   :  { %1459 = vmatprep.subr.bf16.mxu0 %v1458_v0 }
  0x35   :  { %1461 = vmatpush3.bf16.msra.mxu0 %v1458_v0  ;;  %v1518_v0 = vpack.c.bf16 %v940_v63, %v939_v62  ;;  %v966_v62 = vld [vmem:[%s2056_s2 + $0x2f8] sm:$0xff] }
  0x36   :  { %1463 = vmatprep.subr.bf16.mxu0 %v1462_v3 }
  0x39   :  { %1465 = vmatpush3.bf16.msra.mxu0 %v1462_v3  ;;  %v1522_v3 = vpack.c.bf16 %v942_v2, %v941_v1 }
  0x3a   :  { %1467 = vmatprep.subr.bf16.mxu0 %v1466_v6 }
  0x3d   :  { %1469 = vmatpush3.bf16.msra.mxu0 %v1466_v6  ;;  %v1526_v6 = vpack.c.bf16 %v944_v5, %v943_v4 }
  0x3e   :  { %1471 = vmatprep.subr.bf16.mxu0 %v1470_v20 }
  0x41   :  { %1473 = vmatpush3.bf16.msra.mxu0 %v1470_v20  ;;  %v946_v20 = vld [vmem:[%s2056_s2 + $0x268] sm:$0xff] }
  0x42   :  { %1507 = vmatprep.subr.bf16.mxu0 %v1506_v56  ;;  %v1530_v21 = vpack.c.bf16 %v946_v20, %v945_v19  ;;  %v975_v19 = vld [vmem:[%s2056_s2 + $0x330] sm:$0xff]  ;;  %v976_v20 = vld [vmem:[%s2056_s2 + $0x338] sm:$0xff] }
  0xf7   :  { %v1153_v12 = vpop.f32.mrb[0].mxu0 }
  0xf8   :  { %v115_v13 = vadd.f32 %v1153_v12, %v42_v11  ;;  %v109_v14 = vpop.f32.mrb[1].mxu0 }
  0xf9   :  { %v110_v15 = vadd.f32 %v109_v14, %v42_v11 }
  0xfa   :  { %v119_v17 = vmax.f32 %v115_v13, 0.0 }
  0xfb   :  { %v118_v16 = vmax.f32 %v110_v15, 0.0 }
  0xfd   :  { %1186 = vmatprep.mubr.f32.mxu1 %v118_v16 }
  0xfe   :  { %1187 = vmatmul.mubr.f32.vlgmr.msra.gmra.mrb[0].mxu1 %v119_v17 }
  0xff   :  { %1477 = vmatpush3.bf16.msra.mxu1 %v1474_v24  ;;  %v1534_v24 = vpack.c.bf16 %v948_v23, %v947_v22  ;;  %v977_v22 = vld [vmem:[%s2056_s2 + $0x340] sm:$0xff]  ;;  %v978_v23 = vld [vmem:[%s2056_s2 + $0x348] sm:$0xff] }
 0x100   :  { %1479 = vmatprep.subr.bf16.mxu1 %v1478_v26 }
 0x103   :  { %1481 = vmatpush3.bf16.msra.mxu1 %v1478_v26  ;;  %v338_v26 = vrot.slane %v1815_v10, %v337_v25  ;;  %v979_v25 = vld [vmem:[%s2056_s2 + $0x350] sm:$0xff] }
 0x104   :  { %1483 = vmatprep.subr.bf16.mxu1 %v1482_v29 }
 0x107   :  { %1485 = vmatpush3.bf16.msra.mxu1 %v1482_v29 }
 0x108   :  { %1487 = vmatprep.subr.bf16.mxu1 %v1486_v32 }
 0x10b   :  { %1489 = vmatpush3.bf16.msra.mxu1 %v1486_v32 }
 0x10c   :  { %1491 = vmatprep.subr.bf16.mxu1 %v1490_v35 }
 0x10f   :  { %1493 = vmatpush3.bf16.msra.mxu1 %v1490_v35  ;;  %v20_v35 = vld [vmem:[%s2055_s1] sm:$0xff] }
 0x110   :  { %1495 = vmatprep.subr.bf16.mxu1 %v1494_v38 }
 0x113   :  { %1497 = vmatpush3.bf16.msra.mxu1 %v1494_v38 }
 0x114   :  { %1499 = vmatprep.subr.bf16.mxu1 %v1498_v49 }
 0x117   :  { %1501 = vmatpush3.bf16.msra.mxu1 %v1498_v49  ;;  %v957_v49 = vld [vmem:[%s2056_s2 + $0x2b0] sm:$0xff] }
 0x118   :  { %1503 = vmatprep.subr.bf16.mxu1 %v1502_v52  ;;  %v1554_v51 = vpack.c.bf16 %v958_v50, %v957_v49 }
 0x11b   :  { %1505 = vmatpush3.bf16.msra.mxu1 %v1502_v52  ;;  %v959_v52 = vld [vmem:[%s2056_s2 + $0x2c0] sm:$0xff] }
 0x11c   :  { %v1558_v54 = vpack.c.bf16 %v960_v53, %v959_v52 }
 0x1d1   :  { %v1188_v41 = vpop.f32.mrb[0].mxu1 }
 0x1d2   :  { %v213_v42 = vadd.f32 %v1188_v41, %v140_v40  ;;  %v207_v43 = vpop.f32.mrb[1].mxu1  ;;  %v1542_v41 = vpack.c.bf16 %v952_v37, %v951_v36  ;;  %v692_v37 = vsub.s32 5, %v1809_v8 }
 0x1d3   :  { %v208_v44 = vadd.f32 %v207_v43, %v140_v40  ;;  %v954_v43 = vld [vmem:[%s2056_s2 + $0x298] sm:$0xff] }
 0x1d4   :  { %v217_v46 = vmax.f32 %v213_v42, 0.0  ;;  %v953_v42 = vld [vmem:[%s2056_s2 + $0x290] sm:$0xff] }
 0x1d5   :  { %v216_v45 = vmax.f32 %v208_v44, 0.0  ;;  %v1945_v44 = vld [vmem:[%s2055_s1 + $0x8] sm:$0xff] }
 0x1d7   :  { %1221 = vmatprep.mubr.f32.mxu0 %v216_v45 }
 0x1d8   :  { %1222 = vmatmul.mubr.f32.vlgmr.msra.gmra.mrb[2].mxu0 %v217_v46 }
 0x1d9   :  { %1509 = vmatpush3.bf16.msra.mxu0 %v1506_v56  ;;  %v962_v56 = vld [vmem:[%s2056_s2 + $0x2d8] sm:$0xff] }
 0x1da   :  { %1511 = vmatprep.subr.bf16.mxu0 %v1510_v58  ;;  %v1562_v57 = vpack.c.bf16 %v962_v56, %v961_v55 }
 0x1dd   :  { %1513 = vmatpush3.bf16.msra.mxu0 %v1510_v58  ;;  %v963_v58 = vld [vmem:[%s2056_s2 + $0x2e0] sm:$0xff] }
 0x1de   :  { %1515 = vmatprep.subr.bf16.mxu0 %v1514_v61  ;;  %v1566_v60 = vpack.c.bf16 %v964_v59, %v963_v58 }
 0x1e1   :  { %1517 = vmatpush3.bf16.msra.mxu0 %v1514_v61  ;;  %v965_v61 = vld [vmem:[%s2056_s2 + $0x2f0] sm:$0xff] }
 0x1e2   :  { %1519 = vmatprep.subr.bf16.mxu0 %v1518_v0  ;;  %v1570_v63 = vpack.c.bf16 %v966_v62, %v965_v61 }
 0x1e5   :  { %1521 = vmatpush3.bf16.msra.mxu0 %v1518_v0  ;;  %v512_v0 = vsub.s32 4, %v1809_v8 }
 0x1e6   :  { %1523 = vmatprep.subr.bf16.mxu0 %v1522_v3 }
 0x1e7   :  { %v513_v1 = vrot.slane %v1815_v10, %v512_v0 }
 0x1e9   :  { %1525 = vmatpush3.bf16.msra.mxu0 %v1522_v3 }
 0x1ea   :  { %1527 = vmatprep.subr.bf16.mxu0 %v1526_v6 }
 0x1ed   :  { %1529 = vmatpush3.bf16.msra.mxu0 %v1526_v6 }
 0x1ee   :  { %1531 = vmatprep.subr.bf16.mxu0 %v1530_v21 }
 0x1f1   :  { %1533 = vmatpush3.bf16.msra.mxu0 %v1530_v21  ;;  %v1590_v21 = vpack.c.bf16 %v976_v20, %v975_v19 }
 0x1f2   :  { %1535 = vmatprep.subr.bf16.mxu0 %v1534_v24 }
 0x1f5   :  { %1537 = vmatpush3.bf16.msra.mxu0 %v1534_v24  ;;  %v1594_v24 = vpack.c.bf16 %v978_v23, %v977_v22 }
 0x2ab   :  { %v1223_v11 = vpop.f32.mrb[2].mxu0 }
 0x2ac   :  { %v311_v12 = vadd.f32 %v1223_v11, %v238_v9  ;;  %v305_v13 = vpop.f32.mrb[3].mxu0  ;;  %v970_v11 = vld [vmem:[%s2056_s2 + $0x308] sm:$0xff] }
 0x2ad   :  { %v306_v14 = vadd.f32 %v305_v13, %v238_v9  ;;  %v969_v9 = vld [vmem:[%s2056_s2 + $0x300] sm:$0xff] }
 0x2ae   :  { %v315_v15 = vmax.f32 %v311_v12, 0.0  ;;  %v971_v12 = vld [vmem:[%s2056_s2 + $0x310] sm:$0xff]  ;;  %v1578_v13 = vpack.c.bf16 %v970_v11, %v969_v9 }
 0x2af   :  { %v314_v16 = vmax.f32 %v306_v14, 0.0  ;;  %v972_v14 = vld [vmem:[%s2056_s2 + $0x318] sm:$0xff] }
 0x2b0   :  { %v317_v18 = vadd.f32 %v315_v15, %v217_v46  ;;  %v955_v46 = vld [vmem:[%s2056_s2 + $0x2a0] sm:$0xff]  ;;  %v1582_v15 = vpack.c.bf16 %v972_v14, %v971_v12  ;;  %1579 = vmatprep.subr.bf16.mxu0 %v1578_v13 }
 0x2b1   :  { %v316_v17 = vadd.f32 %v314_v16, %v216_v45  ;;  %v1546_v45 = vpack.c.bf16 %v954_v43, %v953_v42  ;;  %v1550_v48 = vpack.c.bf16 %v956_v47, %v955_v46  ;;  %v973_v16 = vld [vmem:[%s2056_s2 + $0x320] sm:$0xff] }
 0x2b3   :  { %1256 = vmatprep.mubr.f32.mxu1 %v316_v17 }
 0x2b4   :  { %1257 = vmatmul.mubr.f32.vlgmr.msra.gmra.mrb[2].mxu1 %v317_v18 }
 0x2b5   :  { %1298 = vmatprep.mubr.msk.f32.mxu1 %vm514_vm0, %v20_v35 }
 0x387   :  { %v1258_v27 = vpop.f32.mrb[2].mxu1 }
 0x388   :  { %v411_v28 = vadd.f32 %v1258_v27, %v338_v26  ;;  %v405_v29 = vpop.f32.mrb[3].mxu1 }
 0x389   :  { %v406_v30 = vadd.f32 %v405_v29, %v338_v26  ;;  %v980_v26 = vld [vmem:[%s2056_s2 + $0x358] sm:$0xff]  ;;  %v982_v29 = vld [vmem:[%s2056_s2 + $0x368] sm:$0xff] }
 0x38a   :  { %v415_v31 = vmax.f32 %v411_v28, 0.0  ;;  %v1598_v27 = vpack.c.bf16 %v980_v26, %v979_v25  ;;  %v981_v28 = vld [vmem:[%s2056_s2 + $0x360] sm:$0xff] }
 0x38b   :  { %v414_v32 = vmax.f32 %v406_v30, 0.0  ;;  %v1602_v30 = vpack.c.bf16 %v982_v29, %v981_v28 }
 0x38c   :  { %v417_v34 = vadd.f32 %v415_v31, %v317_v18 }
 0x38d   :  { %v416_v33 = vadd.f32 %v414_v32, %v316_v17  ;;  %v974_v17 = vld [vmem:[%s2056_s2 + $0x328] sm:$0xff] }
 0x38e   :  { %v1586_v18 = vpack.c.bf16 %v974_v17, %v973_v16 }
 0x38f   :  { %1291 = vmatprep.mubr.f32.mxu0 %v416_v33 }
 0x390   :  { %1292 = vmatmul.mubr.f32.vlgmr.msra.gmra.mrb[4].mxu0 %v417_v34  ;;  %v983_v34 = vld [vmem:[%s2056_s2 + $0x370] sm:$0xff] }
 0x391   :  { %1581 = vmatpush3.bf16.msra.mxu0 %v1578_v13 }
 0x392   :  { %1583 = vmatprep.subr.bf16.mxu0 %v1582_v15 }
 0x395   :  { %1585 = vmatpush3.bf16.msra.mxu0 %v1582_v15 }
 0x396   :  { %1587 = vmatprep.subr.bf16.mxu0 %v1586_v18 }
 0x399   :  { %1589 = vmatpush3.bf16.msra.mxu0 %v1586_v18 }
 0x39a   :  { %1591 = vmatprep.subr.bf16.mxu0 %v1590_v21 }
 0x39d   :  { %1593 = vmatpush3.bf16.msra.mxu0 %v1590_v21 }
 0x39e   :  { %1595 = vmatprep.subr.bf16.mxu0 %v1594_v24 }
 0x3a1   :  { %1597 = vmatpush3.bf16.msra.mxu0 %v1594_v24 }
 0x3a2   :  { %1599 = vmatprep.subr.bf16.mxu0 %v1598_v27 }
 0x3a5   :  { %1601 = vmatpush3.bf16.msra.mxu0 %v1598_v27 }
 0x3a6   :  { %1603 = vmatprep.subr.bf16.mxu0 %v1602_v30 }
 0x3a9   :  { %1605 = vmatpush3.bf16.msra.mxu0 %v1602_v30 }
 0x463   :  { %v1293_v38 = vpop.f32.mrb[4].mxu0 }
 0x464   :  { %v501_v39 = vpop.f32.mrb[5].mxu0 }
 0x465   :  { %v1538_v40 = vpack.c.bf16 %v1293_v38, %v501_v39  ;;  %v693_v38 = vrot.slane %v1815_v10, %v692_v37 }
 0x467   :  { %1539 = vmatprep.subr.bf16.mxu1 %v1538_v40 }
 0x468   :  { %1541 = vmatpush3.bf16.msra.mxu1 %v1538_v40 }
 0x469   :  { %1543 = vmatprep.subr.bf16.mxu1 %v1542_v41 }
 0x46b   :  { %1299 = vmatmul.mubr.msk.f32.vlgmr.msra.gmra.mrb[4].mxu1 %vm514_vm0, %v1945_v44 }
 0x46c   :  { %1545 = vmatpush3.bf16.msra.mxu1 %v1542_v41 }
 0x46d   :  { %1547 = vmatprep.subr.bf16.mxu1 %v1546_v45 }
 0x470   :  { %1549 = vmatpush3.bf16.msra.mxu1 %v1546_v45  ;;  %v790_v45 = vsub.s32 6, %v1809_v8 }
 0x471   :  { %1551 = vmatprep.subr.bf16.mxu1 %v1550_v48 }
 0x472   :  { %v791_v46 = vrot.slane %v1815_v10, %v790_v45 }
 0x474   :  { %1553 = vmatpush3.bf16.msra.mxu1 %v1550_v48 }
 0x475   :  { %1555 = vmatprep.subr.bf16.mxu1 %v1554_v51 }
 0x478   :  { %1557 = vmatpush3.bf16.msra.mxu1 %v1554_v51 }
 0x479   :  { %1559 = vmatprep.subr.bf16.mxu1 %v1558_v54 }
 0x47c   :  { %1561 = vmatpush3.bf16.msra.mxu1 %v1558_v54 }
 0x47d   :  { %1563 = vmatprep.subr.bf16.mxu1 %v1562_v57 }
 0x480   :  { %1565 = vmatpush3.bf16.msra.mxu1 %v1562_v57 }
 0x481   :  { %1567 = vmatprep.subr.bf16.mxu1 %v1566_v60 }
 0x484   :  { %1569 = vmatpush3.bf16.msra.mxu1 %v1566_v60 }
 0x485   :  { %1571 = vmatprep.subr.bf16.mxu1 %v1570_v63 }
 0x488   :  { %1573 = vmatpush3.bf16.msra.mxu1 %v1570_v63 }
 0x53e   :  { %v1300_v2 = vpop.f32.mrb[4].mxu1 }
 0x53f   :  { %v593_v3 = vadd.f32 %v1300_v2, %v513_v1  ;;  %v587_v4 = vpop.f32.mrb[5].mxu1 }
 0x540   :  { %v588_v5 = vadd.f32 %v587_v4, %v513_v1 }
 0x541   :  { %v597_v7 = vmax.f32 %v593_v3, 0.0 }
 0x542   :  { %v596_v6 = vmax.f32 %v588_v5, 0.0 }
 0x544   :  { %1333 = vmatprep.mubr.f32.mxu1 %v596_v6 }
 0x545   :  { %1334 = vmatmul.mubr.f32.vlgmr.msra.gmra.mrb[6].mxu1 %v597_v7 }
 0x546   :  { %1340 = vmatprep.mubr.msk.f32.mxu1 %vm514_vm0, %v20_v35  ;;  %v984_v35 = vld [vmem:[%s2056_s2 + $0x378] sm:$0xff]  ;;  %s1637_s2 = smov [#allocation2]  }
 0x547   :  { %v1606_v36 = vpack.c.bf16 %v984_v35, %v983_v34  ;;  %s874_s28 = sshll.u32 %s1637_s2, 4  ;;  %s875_s28 = int_to_ptr.vmem [resolvable:$true] %s874_s28 }
 0x548   :  { %s1613_s29 = scalar_lea.vmem %s875_s28, 256  ;;  %p1618_p1 = scmp.lt.s32.totalorder %s875_s28, %s875_s28 }
 0x549   :  { %1607 = vmatprep.subr.bf16.mxu0 %v1606_v36  ;;  %p1614_p0 = scmp.ne.s32.totalorder %s875_s28, %s1613_s29  ;;  %p1619_p2 = scmp.lt.s32.totalorder %s1613_s29, %s1613_s29 }
 0x54a   :  { %1609 = vmatpush3.bf16.msra.mxu0 %v1606_v36 }
 0x54b   :  { %p1620_p3 = por %p1619_p2, %p1618_p1 }
 0x54d   :  { %p1621_p4 = pnand %p1620_p3, %p1614_p0 }
 0x618   :  { %v1335_v31 = vpop.f32.mrb[6].mxu1 }
 0x619   :  { %v681_v32 = vpop.f32.mrb[7].mxu1 }
 0x61a   :  { %v1574_v33 = vpack.c.bf16 %v1335_v31, %v681_v32 }
 0x61c   :  { %1575 = vmatprep.subr.bf16.mxu1 %v1574_v33 }
 0x61d   :  { %1577 = vmatpush3.bf16.msra.mxu1 %v1574_v33 }
 0x620   :  { %1341 = vmatmul.mubr.msk.f32.vlgmr.msra.gmra.mrb[8].mxu1 %vm514_vm0, %v1945_v44 }
 0x6f3   :  { %v1342_v39 = vpop.f32.mrb[8].mxu1 }
 0x6f4   :  { %v766_v40 = vadd.f32 %v1342_v39, %v693_v38  ;;  %v760_v41 = vpop.f32.mrb[9].mxu1 }
 0x6f5   :  { %v761_v42 = vadd.f32 %v760_v41, %v693_v38 }
 0x6f6   :  { %v770_v44 = vmax.f32 %v766_v40, 0.0 }
 0x6f7   :  { %v769_v43 = vmax.f32 %v761_v42, 0.0 }
 0x6f9   :  { %1375 = vmatprep.mubr.f32.mxu0 %v769_v43 }
 0x6fa   :  { %1376 = vmatmul.mubr.f32.vlgmr.msra.gmra.mrb[6].mxu0 %v770_v44 }
 0x7cd   :  { %v1377_v47 = vpop.f32.mrb[6].mxu0 }
 0x7ce   :  { %v864_v48 = vadd.f32 %v1377_v47, %v791_v46  ;;  %v858_v49 = vpop.f32.mrb[7].mxu0 }
 0x7cf   :  { %v859_v50 = vadd.f32 %v858_v49, %v791_v46 }
 0x7d0   :  { %868 = vst [vmem:[#allocation2 + $0x8] sm:$0xff] %v864_v48 }
 0x7d1   :  { %867 = vst [vmem:[#allocation2] sm:$0xff] %v859_v50 }
 0x7d2   :  { %1624 = shalt.err (!%p1621_p4)
}
 0x7d3   :  { %s1625_s6 = scalar_lea.hbm %s2058_s4, 256 }
 0x7d4   :  { %p1626_p5 = scmp.ne.s32.totalorder %s2058_s4, %s1625_s6  ;;  %p1629_p6 = scmp.lt.u32.totalorder %s1625_s6, %s2058_s4 }
 0x7d6   :  { %p1631_p7 = pnand %p1629_p6, %p1626_p5 }
 0x7d8   :  { %1634 = shalt.err (!%p1631_p7)
}
 0x7d9   :  { %s1638_s9 = smov 128   ;;  %s1639_s10 = smov 8  }
 0x7da   :  { %880 = dma.vmem_to_hbm [thread:$0]  %s875_s28, 256, %s2058_s4, [#allocation3], %s1638_s9, %s1638_s9, %s1639_s10  }
 0x7db   :  { %1635 = dma.done.wait [#allocation3], 256  }
 0x7dc   :  { %1636 = vsyncadd [#allocation3], 4294967040 }
 0x7dd   :  { %884 = vsyncpa [#allocation3], 1 }

</bundles_post_ra>
